<compile_context>
chip_gen: v7x
topology: tpu7x:2x2x1
jax: 0.10.0
libtpu: 0.0.40
codegen_flags: <defaults>
</compile_context>

<pallas_src>
import jax
import jax.numpy as jnp
from jax.experimental import pallas as pl
from jax.experimental.pallas import tpu as pltpu


def _avg_matrix(L: int, kernel_size: int) -> jax.Array:
    """(L, L) banded averaging matrix A with mean = A @ x.

    mean[t] = (1/k) * sum_{i=0..k-1} x[clip(t + i - pad, 0, L-1)], which is
    exactly the replicate-padded AvgPool1d(kernel_size, stride=1) used by
    MovingAvg; the clip folds the replicate padding into the edge columns.
    """
    pad = (kernel_size - 1) // 2
    rows = jnp.arange(L)[:, None]                                       # (L, 1)
    cols = jnp.clip(rows + jnp.arange(kernel_size)[None, :] - pad, 0, L - 1)
    return jnp.zeros((L, L), jnp.float32).at[rows, cols].add(1.0 / kernel_size)


def _pick_c_tile(C_pad: int, L: int, itemsize: int) -> int:
    """Largest 128-multiple divisor of C_pad within the VMEM budget."""
    budget = 12 * 1024 * 1024                    # double-buffered in + 2 out blocks
    per_lane = 2 * 3 * L * max(itemsize, 4)
    max_tile = max(128, (budget // per_lane) // 128 * 128)
    max_tile = min(max_tile, 2048)               # keep >=2 grid steps for wide C (v7x)
    t = min(max_tile, C_pad)
    t -= t % 128
    t = max(t, 128)
    while C_pad % t:
        t -= 128
    return t


def _kernel(a_ref, x_ref, res_ref, mean_ref):
    # a_ref: (L, L) f32 banded averaging matrix (fetched once, block idx constant)
    # x_ref / res_ref / mean_ref: (L, c_tile) blocks (batch dim squeezed out)
    mean = jnp.dot(a_ref[...], x_ref[...].astype(jnp.float32),
                   precision=jax.lax.Precision.HIGHEST,
                   preferred_element_type=jnp.float32)
    mean_ref[...] = mean.astype(mean_ref.dtype)
    # Re-read x from VMEM for the residual (cheap vld; avoids holding a full
    # f32 block live across the matmul and spilling vregs).
    res_ref[...] = (x_ref[...].astype(jnp.float32) - mean).astype(res_ref.dtype)


def series_decomp(x: jax.Array, kernel_size: int, c_tile: int | None = None):
    """Returns (res, moving_mean), both shaped like x = (B, L, C)."""
    assert kernel_size >= 1 and kernel_size % 2 == 1, \
        "SeriesDecomp requires odd kernel_size for shape match"
    B, L, C = x.shape
    itemsize = jnp.dtype(x.dtype).itemsize

    # Lane-dense channels: pad C up to a multiple of 128, slice outputs back.
    C_pad = max(128, ((C + 127) // 128) * 128)
    if C_pad != C:
        x = jnp.pad(x, ((0, 0), (0, 0), (0, C_pad - C)))

    if c_tile is None:
        c_tile = _pick_c_tile(C_pad, L, itemsize)
    assert C_pad % c_tile == 0 and c_tile % 128 == 0
    n_c = C_pad // c_tile

    A = _avg_matrix(L, kernel_size)

    a_spec = pl.BlockSpec((L, L), lambda b, c: (0, 0))        # constant block -> DMA'd once
    x_spec = pl.BlockSpec((pl.Squeezed(), L, c_tile), lambda b, c: (b, 0, c))
    o_spec = pl.BlockSpec((pl.Squeezed(), L, c_tile), lambda b, c: (b, 0, c))

    out_shape = (
        jax.ShapeDtypeStruct((B, L, C_pad), x.dtype),   # res
        jax.ShapeDtypeStruct((B, L, C_pad), x.dtype),   # moving_mean
    )

    cost = pl.CostEstimate(
        flops=int(2 * B * L * L * C_pad + B * L * C_pad),
        transcendentals=0,
        bytes_accessed=int(3 * B * L * C_pad * itemsize + L * L * 4),
    )

    # Explicit VMEM budget: 2 buffers x (1 in + 2 out) blocks + A (x2) + margin.
    vmem_needed = 2 * 3 * L * c_tile * max(itemsize, 4) + 2 * L * L * 4 + (2 << 20)
    vmem_limit = int(min(max(vmem_needed, 16 << 20), 48 << 20))

    res, mean = pl.pallas_call(
        _kernel,
        grid=(B, n_c),
        in_specs=[a_spec, x_spec],
        out_specs=[o_spec, o_spec],
        out_shape=out_shape,
        compiler_params=pltpu.CompilerParams(
            dimension_semantics=("parallel", "parallel"),
            vmem_limit_bytes=vmem_limit),
        cost_estimate=cost,
    )(A, x)

    if C_pad != C:
        res, mean = res[:, :, :C], mean[:, :, :C]
    return res, mean


def _reference(x, kernel_size):
    # Pure-JAX reference mirroring the PyTorch semantics.
    pad = (kernel_size - 1) // 2
    front = jnp.repeat(x[:, 0:1, :], pad, axis=1)
    end = jnp.repeat(x[:, -1:, :], pad, axis=1)
    xp = jnp.concatenate([front, x, end], axis=1)
    L = x.shape[1]
    mean = sum(xp[:, i:i + L, :] for i in range(kernel_size)) / kernel_size
    return x - mean, mean


if __name__ == "__main__":
    # SeriesDecomp has no learnable parameters; kernel_size = 25 (DLinear default).
    KERNEL_SIZE = 25
    key = jax.random.PRNGKey(0)

    # Two small shapes: one exercises the C-padding path (C=7, typical DLinear
    # channel count), one the lane-dense path.
    for shape in [(2, 96, 7), (2, 96, 512)]:
        key, sub = jax.random.split(key)
        x = jax.random.normal(sub, shape, dtype=jnp.float32)

        res, mean = series_decomp(x, KERNEL_SIZE)
        res, mean = jax.block_until_ready(res), jax.block_until_ready(mean)

        res_ref, mean_ref = _reference(x, KERNEL_SIZE)
        assert res.shape == shape and mean.shape == shape
        assert jnp.allclose(mean, mean_ref, atol=1e-5, rtol=1e-5)
        assert jnp.allclose(res, res_ref, atol=1e-5, rtol=1e-5)

    print("KERNEL_OK")
</pallas_src>

<mosaic_0001>
module attributes {stable_mosaic.version = 11 : i64} {
  func.func @_kernel(%arg0: i32, %arg1: i32, %arg2: memref<96x96xf32, #tpu.memory_space<vmem>>, %arg3: memref<1x96x128xf32, #tpu.memory_space<vmem>>, %arg4: memref<1x96x128xf32, #tpu.memory_space<vmem>>, %arg5: memref<1x96x128xf32, #tpu.memory_space<vmem>>) attributes {dimension_semantics = [#tpu.dimension_semantics<parallel>, #tpu.dimension_semantics<parallel>], iteration_bounds = array<i64: 2, 1>, scalar_prefetch = 0 : i64, scratch_operands = 0 : i64, tpu.core_type = #tpu.core_type<tc>, window_params = [{pipeline_mode = #tpu.pipeline_mode<synchronous>, transform_indices = @transform_0, window_bounds = array<i64: 96, 96>}, {transform_indices = @transform_1, window_bounds = array<i64: 1, 96, 128>}, {transform_indices = @transform_2, window_bounds = array<i64: 1, 96, 128>}, {transform_indices = @transform_3, window_bounds = array<i64: 1, 96, 128>}]} {
    %c0 = arith.constant 0 : index
    %c0_0 = arith.constant 0 : index
    %0 = vector.load %arg2[%c0, %c0_0] : memref<96x96xf32, #tpu.memory_space<vmem>>, vector<96x96xf32>
    %c0_1 = arith.constant 0 : index
    %c0_2 = arith.constant 0 : index
    %c0_3 = arith.constant 0 : index
    %1 = vector.load %arg3[%c0_1, %c0_2, %c0_3] : memref<1x96x128xf32, #tpu.memory_space<vmem>>, vector<1x96x128xf32>
    %2 = vector.shape_cast %1 : vector<1x96x128xf32> to vector<96x128xf32>
    %cst = arith.constant dense<0.000000e+00> : vector<96x128xf32>
    %3 = tpu.matmul %0, %2, %cst {dimension_numbers = #tpu.dot_dimension_numbers<[1], [0], [0], [1], [0, 0, 1, 1], [], []>, precision = #tpu.contract_precision<fp32>} : vector<96x96xf32>, vector<96x128xf32>, vector<96x128xf32> -> vector<96x128xf32>
    %c0_4 = arith.constant 0 : index
    %c0_5 = arith.constant 0 : index
    %c0_6 = arith.constant 0 : index
    %4 = vector.load %arg5[%c0_4, %c0_5, %c0_6] : memref<1x96x128xf32, #tpu.memory_space<vmem>>, vector<1x96x128xf32>
    %5 = vector.shape_cast %4 : vector<1x96x128xf32> to vector<96x128xf32>
    %6 = vector.shape_cast %3 : vector<96x128xf32> to vector<1x96x128xf32>
    tpu.vector_store %arg5[%c0_4, %c0_5, %c0_6], %6 {strides = array<i32>} : memref<1x96x128xf32, #tpu.memory_space<vmem>>, vector<1x96x128xf32>,
    %c0_7 = arith.constant 0 : index
    %c0_8 = arith.constant 0 : index
    %c0_9 = arith.constant 0 : index
    %7 = vector.load %arg3[%c0_7, %c0_8, %c0_9] : memref<1x96x128xf32, #tpu.memory_space<vmem>>, vector<1x96x128xf32>
    %8 = vector.shape_cast %7 : vector<1x96x128xf32> to vector<96x128xf32>
    %9 = arith.subf %8, %3 : vector<96x128xf32>
    %c0_10 = arith.constant 0 : index
    %c0_11 = arith.constant 0 : index
    %c0_12 = arith.constant 0 : index
    %10 = vector.load %arg4[%c0_10, %c0_11, %c0_12] : memref<1x96x128xf32, #tpu.memory_space<vmem>>, vector<1x96x128xf32>
    %11 = vector.shape_cast %10 : vector<1x96x128xf32> to vector<96x128xf32>
    %12 = vector.shape_cast %9 : vector<96x128xf32> to vector<1x96x128xf32>
    tpu.vector_store %arg4[%c0_10, %c0_11, %c0_12], %12 {strides = array<i32>} : memref<1x96x128xf32, #tpu.memory_space<vmem>>, vector<1x96x128xf32>,
    return
  }
  func.func @transform_0(%arg0: i32, %arg1: i32) -> (i32, i32) {
    %c0_i32 = arith.constant 0 : i32
    %c0_i32_0 = arith.constant 0 : i32
    %c0_i32_1 = arith.constant 0 : i32
    return %c0_i32, %c0_i32_0 : i32, i32
  }
  func.func @transform_1(%arg0: i32, %arg1: i32) -> (i32, i32, i32) {
    %c0_i32 = arith.constant 0 : i32
    %c0_i32_0 = arith.constant 0 : i32
    return %arg0, %c0_i32, %arg1 : i32, i32, i32
  }
  func.func @transform_2(%arg0: i32, %arg1: i32) -> (i32, i32, i32) {
    %c0_i32 = arith.constant 0 : i32
    %c0_i32_0 = arith.constant 0 : i32
    return %arg0, %c0_i32, %arg1 : i32, i32, i32
  }
  func.func @transform_3(%arg0: i32, %arg1: i32) -> (i32, i32, i32) {
    %c0_i32 = arith.constant 0 : i32
    %c0_i32_0 = arith.constant 0 : i32
    return %arg0, %c0_i32, %arg1 : i32, i32, i32
  }
}

</mosaic_0001>

<bundles_post_ra>
// kernel: tpu_custom_call.1
= control target key start
LH: loop header
LB: loop body
LE: loop exit
PB: predicated region body
PF: predicated region fallthrough
CT: control target
= control target key end

     0   :  { %9 = vsyncpa [#allocation3], 0  ;;  %s3191_s0 = inlined_call_operand.hbm [shape: f32[96,96], index: 0, kind: input, shape index: {}]   ;;  %s3192_s1 = inlined_call_operand.hbm [shape: f32[2,96,128], index: 1, kind: input, shape index: {}]   ;;  %s3193_s2 = inlined_call_operand.hbm [shape: f32[2,96,128], index: 2, kind: output, shape index: {0}]   ;;  %s3194_s3 = inlined_call_operand.hbm [shape: f32[2,96,128], index: 3, kind: output, shape index: {1}]  }
   0x1   :  { %10 = vsyncpa [#allocation6], 0 }
   0x2   :  { %12 = vsyncpa [#allocation6 + $0x1], 0 }
   0x3   :  { %13 = vsyncpa [#allocation4], 0 }
   0x4   :  { %15 = vsyncpa [#allocation4 + $0x1], 0 }
   0x5   :  { %16 = vsyncpa [#allocation9], 0 }
   0x6   :  { %18 = vsyncpa [#allocation9 + $0x1], 0  ;;  %s2478_s12 = smov 0   ;;  %s2480_s13 = smov 0  }
   0x7   :  { %s2482_s14 = smov 0   ;;  %s2484_s15 = smov 0  }
   0x8   :  { %s2486_s16 = smov 0   ;;  %s2488_s17 = smov 0  }
   0x9 LB: > { %s1573_s18 = sadd.s32 4294967295, %s2448_s17   ;;  %s1574_s19 = sadd.s32 4294967294, %s2448_s17   ;;  %s2448_s17 = sphi %s2488_s17, %s24_s17   ;;  %s2444_s16 = sphi %s2486_s16, %s3299_s16   ;;  %s2440_s15 = sphi %s2484_s15, %s3298_s15   ;;  %s2436_s14 = sphi %s2482_s14, %s3297_s14   ;;  %s2432_s13 = sphi %s2480_s13, %s3296_s13   ;;  %s2428_s12 = sphi %s2478_s12, %s3295_s12  }
   0xa   : > { %p79_p0 = scmp.ne.s32.totalorder %s2432_s13, %s2428_s12  ;;  %p2512_p1 = scmp.eq.s32.totalorder %s1573_s18, 0 }
   0xb   : > { %p2516_p2 = scmp.eq.s32.totalorder %s1573_s18, 1  ;;  %p111_p3 = scmp.eq.s32.totalorder %s1574_s19, 1 }
   0xc   : > { %s3228_s20 = scalar_select %p2512_p1, 1, 0 }
   0xd   : > { %s3229_s21 = scalar_select %p2516_p2, 1, 0 }
   0xe   : > { %p2522_p4 = por %p2512_p1, %p79_p0  ;;  %p1575_p5 = scmp.ge.s32.totalorder %s2448_s17, 1 }
   0xf   : > { %p2527_p6 = por %p111_p3, %p79_p0  ;;  %p146_p7 = scmp.lt.s32.totalorder %s2448_s17, 3 }
  0x10   : > { %s3230_s22 = scalar_select %p2522_p4, 1, 0 }
  0x11   : > { %s3231_s23 = scalar_select %p2527_p6, 1, 0 }
  0x12   : > { %p2532_p8 = pnand %p1575_p5, %p146_p7  ;;  %s2450_s25 = smov [#allocation2]  }
  0x13   : > { %s158_s26 = sshll.u32 %s2450_s25, 4  ;;  %s36_s28 = sadd.s32 1, %s2444_s16  ;;  %s159_s26 = int_to_ptr.vmem [resolvable:$true] %s158_s26 }
  0x14   : > { %s3232_s24 = scalar_select %p2532_p8, 1, 0 }
  0x15   : > { %p2200_p9 = pneg %p2532_p8  ;;  %s2272_s4 = scalar_lea.hbm %s3191_s0, 1536 }
  0x16   : > { %p2273_p12 = scmp.ne.s32.totalorder %s3191_s0, %s2272_s4  ;;  %p2279_p5 = scmp.lt.u32.totalorder %s2272_s4, %s3191_s0 }
  0x17   : > { %p2541_p11 = pnand %p2200_p9, %p2512_p1 }
  0x19   : > { %p2274_p13 = pneg %p2541_p11 }
  0x1b   : > { %p2275_p0 = pnand %p2274_p13, %p2273_p12 }
  0x1d   : > { %p2276_p3 = pneg %p2275_p0 }
  0x1f   : > { %p2281_p7 = pnand %p2279_p5, %p2276_p3 }
  0x21   : > { %2284 = shalt.err (!%p2281_p7)
}
  0x22   : > { %s2285_s9 = scalar_lea.vmem %s159_s26, 1536  ;;  %p2293_p4 = scmp.lt.s32.totalorder %s159_s26, %s159_s26 }
  0x23   : > { %p2286_p9 = scmp.ne.s32.totalorder %s159_s26, %s2285_s9  ;;  %p2294_p1 = scmp.lt.s32.totalorder %s2285_s9, %s2285_s9 }
  0x25   : > { %p2288_p10 = pnand %p2286_p9, %p2274_p13  ;;  %p2295_p8 = por %p2294_p1, %p2293_p4 }
  0x27   : > { %p2289_p6 = pneg %p2288_p10 }
  0x29   : > { %p2296_p2 = pnand %p2295_p8, %p2289_p6 }
  0x2b   : > { %2299 = shalt.err (!%p2296_p2)
}
  0x2c   : > { %s2451_s10 = smov 128   ;;  %s2452_s11 = smov 8  }
  0x2d   : > { %2203 = dma.hbm_to_vmem [thread:$0]  (!%p2541_p11), %s3191_s0, 1536, %s159_s26, [#allocation3], %s2451_s10, %s2451_s10, %s2452_s11  }
  0x2e   : > { %p38_p1 = scmp.ge.s32.totalorder %s36_s28, 2  ;;  %s66_s25 = sadd.s32 1, %s2436_s14 }
  0x2f   : > { %p73_p2 = scmp.ne.s32.totalorder %s2436_s14, %s2432_s13  ;;  %p74_p4 = scmp.eq.s32.totalorder %s2448_s17, 0 }
  0x30   : > { %s3301_s28 = smov (%p38_p1, %s36_s28), 0  ;;  %p3234_p8 = scmp.ne.s32.totalorder %s3229_s21, 0 }
  0x31   : > { %p75_p6 = por %p74_p4, %p73_p2  ;;  %s61_s27 = ssub.s32 %s2444_s16, %s3301_s28 }
  0x32   : > { %p2573_p10 = por %p3234_p8, %p73_p2  ;;  %p2216_p12 = scmp.lt.s32.totalorder %s2448_s17, 2 }
  0x33   : > { %p64_p13 = scmp.eq.s32.totalorder %s61_s27, 0  ;;  %s172_s30 = sand.u32 1, %s2436_s14  }
  0x34   : > { %s2185_s4 = smul.u32 96, %s172_s30  ;;  %p2585_p11 = pnand %p2216_p12, %p75_p6 }
  0x35   : > { %s2582_s5 = scalar_select %p64_p13, %s2436_s14, %s66_s25  }
  0x36   : > { %s2186_s26 = smul.u32 1536, %s2444_s16  ;;  %s176_s6 = scalar_lea.vmem [#allocation5], %s2185_s4 }
  0x37   : > { %s184_s7 = sshll.u32 %s176_s6, 4  ;;  %s2596_s19 = scalar_lea.sflag [#allocation6], %s172_s30  ;;  %s2594_s7 = int_to_ptr.vmem [resolvable:$true] %s184_s7 }
  0x38   : > { %s2592_s18 = scalar_lea.hbm %s3192_s1, %s2186_s26  ;;  %p2302_p3 = pneg %p2585_p11 }
  0x39   : > { %s2300_s25 = scalar_lea.hbm %s2592_s18, 1536  ;;  %s2305_s26 = scalar_lea.hbm %s3192_s1, 3072 }
  0x3a   : > { %p2301_p0 = scmp.ne.s32.totalorder %s2592_s18, %s2300_s25  ;;  %p2306_p9 = scmp.lt.u32.totalorder %s2592_s18, %s3192_s1 }
  0x3b   : > { %p2307_p1 = scmp.lt.u32.totalorder %s2305_s26, %s2300_s25  ;;  %p2309_p4 = scmp.lt.u32.totalorder %s2300_s25, %s2592_s18 }
  0x3c   : > { %p2303_p5 = pnand %p2302_p3, %p2301_p0 }
  0x3d   : > { %p2308_p2 = por %p2307_p1, %p2306_p9 }
  0x3e   : > { %p2304_p7 = pneg %p2303_p5 }
  0x3f   : > { %p2310_p6 = por %p2309_p4, %p2308_p2 }
  0x41   : > { %p2311_p8 = pnand %p2310_p6, %p2304_p7 }
  0x43   : > { %2314 = shalt.err (!%p2311_p8)
}
  0x44   : > { %s2315_s30 = scalar_lea.vmem %s2594_s7, 1536  ;;  %s2453_s21 = smov [#allocation5]  }
  0x45   : > { %p2316_p12 = scmp.ne.s32.totalorder %s2594_s7, %s2315_s30  ;;  %s2320_s27 = sshll.u32 %s2453_s21, 4  ;;  %s2321_s27 = int_to_ptr.vmem [resolvable:$false] %s2320_s27 }
  0x46   : > { %s2322_s4 = scalar_lea.vmem %s2321_s27, 3072  ;;  %p2323_p5 = scmp.lt.s32.totalorder %s2594_s7, %s2321_s27 }
  0x47   : > { %p2318_p13 = pnand %p2316_p12, %p2302_p3  ;;  %p2324_p9 = scmp.lt.s32.totalorder %s2322_s4, %s2315_s30 }
  0x49   : > { %p2319_p0 = pneg %p2318_p13  ;;  %p2325_p1 = por %p2324_p9, %p2323_p5 }
  0x4b   : > { %p2326_p2 = pnand %p2325_p1, %p2319_p0 }
  0x4d   : > { %2329 = shalt.err (!%p2326_p2)
}
  0x4e   : > { %2207 = dma.hbm_to_vmem [thread:$0]  (!%p2585_p11), %s2592_s18, 1536, %s2594_s7, %s2596_s19, %s2451_s10, %s2451_s10, %s2452_s11  }
  0x4f   : > { %p3237_p3 = scmp.ne.s32.totalorder %s3232_s24, 0 }
  0x51   : > { %196 = sbr.rel (%p3237_p3) target bundleno = 449 (0x1c1), region = 28 }
  0x58   : > { %p3238_p7 = scmp.ne.s32.totalorder %s3228_s20, 0 }
  0x5a   : > { %2411 = dma.done.wait (%p3238_p7), [#allocation3], 1536  }
  0x5b   : > { %2413 = vsyncadd (%p3238_p7), [#allocation3], 4294965760  ;;  %s2634_s25 = sand.u32 1, %s2432_s13   ;;  %p3239_p11 = scmp.ne.s32.totalorder %s3230_s22, 0 }
  0x5c   : > { %s2637_s8 = smul.u32 96, %s2634_s25  ;;  %s203_s26 = scalar_lea.sflag [#allocation6], %s2634_s25 }
  0x5e   : > { %s2641_s10 = scalar_lea.vmem [#allocation5], %s2637_s8 }
  0x5f   : > { %2415 = dma.done.wait (%p3239_p11), %s203_s26, 1536  }
  0x60   : > { %2417 = vsyncadd (%p3239_p11), %s203_s26, 4294965760  ;;  %v2648_v0 = vld [vmem:[%s2641_s10] sm:$0xff]  ;;  %v2651_v1 = vld [vmem:[%s2641_s10 + $0x8] sm:$0xff]  ;;  %vm258_vm0 = vcmask 785408   ;;  %s3056_s20 = scalar_lea.vmem [#allocation8], %s2637_s8  ;;  %s3063_s22 = scalar_lea.vmem [#allocation7], %s2637_s8 }
  0x61   : > { %3240 = vst [vmem:[#allocation14_spill] sm:$0xff] %v2648_v0  ;;  %3241 = vst [vmem:[#allocation15_spill] sm:$0xff] %v2651_v1  ;;  %v2654_v2 = vld [vmem:[%s2641_s10 + $0x10] sm:$0xff]  ;;  %v296_v3 = vand.u32 4294901760, %v2648_v0  ;;  %v299_v4 = vand.u32 4294901760, %v2651_v1  ;;  %v2659_v5 = vld [vmem:[%s2641_s10 + $0x18] sm:$0xff] }
  0x62   : > { %3242 = vst [vmem:[#allocation16_spill] sm:$0xff] %v2654_v2  ;;  %3243 = vst [vmem:[#allocation17_spill] sm:$0xff] %v2659_v5  ;;  %v302_v6 = vand.u32 4294901760, %v2654_v2  ;;  %v2663_v7 = vld [vmem:[%s2641_s10 + $0x20] sm:$0xff]  ;;  %v2666_v8 = vld [vmem:[%s2641_s10 + $0x28] sm:$0xff]  ;;  %v305_v9 = vand.u32 4294901760, %v2659_v5 }
  0x63   : > { %3244 = vst [vmem:[#allocation18_spill] sm:$0xff] %v2663_v7  ;;  %3245 = vst [vmem:[#allocation19_spill] sm:$0xff] %v2666_v8  ;;  %v308_v10 = vand.u32 4294901760, %v2663_v7  ;;  %v311_v11 = vand.u32 4294901760, %v2666_v8  ;;  %v2672_v12 = vld [vmem:[%s2641_s10 + $0x30] sm:$0xff]  ;;  %v2675_v13 = vld [vmem:[%s2641_s10 + $0x38] sm:$0xff]  ;;  %v2680_v15 = vpack.c.bf16 %v299_v4, %v296_v3  ;;  %v2712_v33 = vsub.f32 %v2648_v0, %v296_v3 }
  0x64   : > { %3246 = vst [vmem:[#allocation20_spill] sm:$0xff] %v2672_v12  ;;  %3247 = vst [vmem:[#allocation21_spill] sm:$0xff] %v2675_v13  ;;  %v2678_v14 = vld [vmem:[%s2641_s10 + $0x40] sm:$0xff]  ;;  %v314_v16 = vand.u32 4294901760, %v2672_v12  ;;  %v317_v17 = vand.u32 4294901760, %v2675_v13  ;;  %v2685_v18 = vld [vmem:[%s2641_s10 + $0x48] sm:$0xff]  ;;  %v2690_v20 = vpack.c.bf16 %v305_v9, %v302_v6  ;;  %v2726_v36 = vsub.f32 %v2651_v1, %v299_v4 }
  0x65   : > { %3248 = vst [vmem:[#allocation22_spill] sm:$0xff] %v2678_v14  ;;  %3249 = vst [vmem:[#allocation23_spill] sm:$0xff] %v2685_v18  ;;  %v2688_v19 = vld [vmem:[%s2641_s10 + $0x50] sm:$0xff]  ;;  %v3205_v21 = vand.u32 4294901760, %v2678_v14  ;;  %v234_v22 = vld [vmem:[#allocation2] sm:$0xff]  ;;  %1982 = vmatprep.subr.bf16.mxu1 %v2680_v15  ;;  %2054 = vmatprep.subr.bf16.mxu0 %v2680_v15  ;;  %v2699_v25 = vpack.c.bf16 %v311_v11, %v308_v10  ;;  %v3204_v26 = vand.u32 4294901760, %v2685_v18 }
  0x66   : > { %3250 = vst [vmem:[#allocation24_spill] sm:$0xff] %v2688_v19  ;;  %v235_v23 = vld [vmem:[#allocation2 + $0x8] sm:$0xff]  ;;  %v236_v24 = vld [vmem:[#allocation2 + $0x10] sm:$0xff]  ;;  %v260_v27 = vsel %vm258_vm0, %v234_v22, 0  ;;  %v237_v29 = vld [vmem:[#allocation2 + $0x18] sm:$0xff]  ;;  %1984 = vmatpush3.bf16.msra.mxu1 %v2680_v15  ;;  %2056 = vmatpush3.bf16.msra.mxu0 %v2680_v15  ;;  %v3201_v30 = vand.u32 4294901760, %v2688_v19  ;;  %v2720_v34 = vpack.c.bf16 %v317_v17, %v314_v16  ;;  %v2743_v45 = vsub.f32 %v2654_v2, %v302_v6 }
  0x67   : > { %v263_v28 = vsel %vm258_vm0, %v235_v23, 0  ;;  %v2707_v31 = vand.u32 4294901760, %v260_v27  ;;  %1986 = vmatprep.subr.bf16.mxu1 %v2690_v20  ;;  %2058 = vmatprep.subr.bf16.mxu0 %v2690_v20  ;;  %v2723_v35 = vld [vmem:[%s2641_s10 + $0x58] sm:$0xff]  ;;  %v266_v37 = vsel %vm258_vm0, %v236_v24, 0  ;;  %v269_v38 = vsel %vm258_vm0, %v237_v29, 0  ;;  %v238_v55 = vld [vmem:[#allocation2 + $0x20] sm:$0xff] }
  0x68   : > { %v2709_v32 = vand.u32 4294901760, %v263_v28  ;;  %3251 = vst [vmem:[#allocation25_spill] sm:$0xff] %v2723_v35  ;;  %v495_v41 = vand.u32 4294901760, %v2712_v33  ;;  %v2737_v42 = vand.u32 4294901760, %v266_v37  ;;  %v502_v43 = vand.u32 4294901760, %v2726_v36  ;;  %v239_v61 = vld [vmem:[#allocation2 + $0x28] sm:$0xff] }
  0x69   : > { %v2731_v39 = vsub.f32 %v260_v27, %v2707_v31  ;;  %v2740_v44 = vand.u32 4294901760, %v269_v38  ;;  %v2746_v46 = vsub.f32 %v2659_v5, %v305_v9  ;;  %v3199_v47 = vand.u32 4294901760, %v2723_v35  ;;  %v240_v24 = vld [vmem:[#allocation2 + $0x30] sm:$0xff]  ;;  %v241_v27 = vld [vmem:[#allocation2 + $0x38] sm:$0xff]  ;;  %s2188_s24 = smul.u32 1536, %s2440_s15  ;;  %s1442_s11 = sshll.u32 %s3056_s20, 4  ;;  %s3099_s11 = int_to_ptr.vmem [resolvable:$true] %s1442_s11 }
  0x6a   : > { %v2734_v40 = vsub.f32 %v263_v28, %v2709_v32  ;;  %1988 = vmatpush3.bf16.msra.mxu1 %v2690_v20  ;;  %2060 = vmatpush3.bf16.msra.mxu0 %v2690_v20  ;;  %v2754_v50 = vsub.f32 %v266_v37, %v2737_v42  ;;  %v2759_v51 = vsub.f32 %v2712_v33, %v495_v41  ;;  %v3206_v54 = vand.u32 4294901760, %v2743_v45  ;;  %v242_v28 = vld [vmem:[#allocation2 + $0x40] sm:$0xff]  ;;  %s1425_s7 = sshll.u32 %s3063_s22, 4  ;;  %s1411_s21 = scalar_lea.sflag [#allocation9], %s2634_s25  ;;  %s3110_s7 = int_to_ptr.vmem [resolvable:$true] %s1425_s7 }
  0x6b   : > { %3252 = vst [vmem:[#allocation26_spill] sm:$0xff] %v2731_v39  ;;  %v374_v48 = vand.u32 4294901760, %v2731_v39  ;;  %1990 = vmatprep.subr.bf16.mxu1 %v2699_v25  ;;  %2062 = vmatprep.subr.bf16.mxu0 %v2699_v25  ;;  %v2762_v52 = vsub.f32 %v2726_v36, %v502_v43  ;;  %v2765_v53 = vsub.f32 %v269_v38, %v2740_v44  ;;  %v516_v60 = vand.u32 4294901760, %v2746_v46  ;;  %s3097_s19 = scalar_lea.hbm %s3194_s3, %s2188_s24  ;;  %s3108_s30 = scalar_lea.hbm %s3193_s2, %s2188_s24 }
  0x6c   : > { %3253 = vst [vmem:[#allocation27_spill] sm:$0xff] %v2734_v40  ;;  %v3203_v49 = vand.u32 4294901760, %v2734_v40  ;;  %3254 = vst [vmem:[#allocation28_spill] sm:$0xff] %v2754_v50  ;;  %v3202_v58 = vand.u32 4294901760, %v2754_v50  ;;  %v2783_v62 = vpack.c.bf16 %v3204_v26, %v3205_v21  ;;  %v2789_v63 = vpack.c.bf16 %v3199_v47, %v3201_v30  ;;  %s2330_s27 = scalar_lea.vmem %s3099_s11, 1536  ;;  %s2454_s4 = smov [#allocation8]  }
  0x6d   : > { %3255 = vst [vmem:[#allocation29_spill] sm:$0xff] %v2765_v53  ;;  %v375_v56 = vsub.f32 %v2731_v39, %v374_v48  ;;  %1879 = vmatprep.mubr.f32.mxu0 %v374_v48  ;;  %v3200_v59 = vand.u32 4294901760, %v2765_v53  ;;  %v272_v4 = vsel %vm258_vm0, %v238_v55, 0  ;;  %v497_v6 = vand.u32 4294901760, %v2759_v51  ;;  %p2331_p4 = scmp.ne.s32.totalorder %s3099_s11, %s2330_s27  ;;  %s2334_s8 = sshll.u32 %s2454_s4, 4  ;;  %s2335_s8 = int_to_ptr.vmem [resolvable:$false] %s2334_s8 }
  0x6e   : > { %v2772_v57 = vsub.f32 %v2734_v40, %v3203_v49  ;;  %1992 = vmatpush3.bf16.msra.mxu1 %v2699_v25  ;;  %2064 = vmatpush3.bf16.msra.mxu0 %v2699_v25  ;;  %v504_v9 = vand.u32 4294901760, %v2762_v52  ;;  %v2796_v22 = vpack.c.bf16 %v502_v43, %v495_v41  ;;  %v510_v23 = vsub.f32 %v2743_v45, %v3206_v54  ;;  %s2336_s26 = scalar_lea.vmem %s2335_s8, 3072  ;;  %p2337_p12 = scmp.lt.s32.totalorder %s3099_s11, %s2335_s8 }
  0x6f   : > { %v376_v3 = vand.u32 4294901760, %v375_v56  ;;  %1994 = vmatprep.subr.bf16.mxu1 %v2720_v34  ;;  %2066 = vmatprep.subr.bf16.mxu0 %v2720_v34  ;;  %v2805_v29 = vsub.f32 %v2754_v50, %v3202_v58  ;;  %v2807_v37 = vand.u32 4294901760, %v272_v4  ;;  %v275_v38 = vsel %vm258_vm0, %v239_v61, 0  ;;  %p2332_p6 = pnand %p2331_p4, %p2573_p10  ;;  %p2338_p13 = scmp.lt.s32.totalorder %s2336_s26, %s2330_s27 }
  0x70   : > { %v2813_v41 = vsub.f32 %v2765_v53, %v3200_v59  ;;  %v517_v43 = vsub.f32 %v2746_v46, %v516_v60  ;;  %v2816_v48 = vand.u32 4294901760, %v275_v38  ;;  %v2821_v51 = vsub.f32 %v2663_v7, %v308_v10  ;;  %v243_v7 = vld [vmem:[#allocation2 + $0x48] sm:$0xff] }
  0x71   : > { %1753 = vmatprep.mubr.f32.mxu1 %v376_v3  ;;  %v2826_v52 = vsub.f32 %v272_v4, %v2807_v37  ;;  %v2831_v55 = vsub.f32 %v2666_v8, %v311_v11  ;;  %v278_v56 = vsel %vm258_vm0, %v240_v24, 0  ;;  %v281_v61 = vsel %vm258_vm0, %v241_v27, 0  ;;  %p2333_p8 = pneg %p2332_p6  ;;  %p2339_p0 = por %p2338_p13, %p2337_p12 }
  0x72   : > { %1996 = vmatpush3.bf16.msra.mxu1 %v2720_v34  ;;  %2068 = vmatpush3.bf16.msra.mxu0 %v2720_v34  ;;  %v511_v10 = vand.u32 4294901760, %v510_v23  ;;  %v2838_v3 = vsub.f32 %v275_v38, %v2816_v48  ;;  %v523_v4 = vand.u32 4294901760, %v2821_v51  ;;  %v2841_v47 = vand.u32 4294901760, %v278_v56 }
  0x73   : > { %1998 = vmatprep.subr.bf16.mxu1 %v2783_v62  ;;  %2070 = vmatprep.subr.bf16.mxu0 %v2783_v62  ;;  %v3207_v59 = vand.u32 4294901760, %v2826_v52  ;;  %v530_v11 = vand.u32 4294901760, %v2831_v55  ;;  %v2845_v30 = vand.u32 4294901760, %v281_v61  ;;  %v2850_v24 = vsub.f32 %v2672_v12, %v314_v16  ;;  %p2340_p5 = pnand %p2339_p0, %p2333_p8 }
  0x74   : > { %v518_v27 = vand.u32 4294901760, %v517_v43  ;;  %v524_v23 = vsub.f32 %v2821_v51, %v523_v4  ;;  %v2854_v38 = vsub.f32 %v278_v56, %v2841_v47  ;;  %v2859_v58 = vsub.f32 %v2675_v13, %v317_v17 }
  0x75   : > { %v2866_v16 = vsub.f32 %v2826_v52, %v3207_v59  ;;  %v531_v49 = vsub.f32 %v2831_v55, %v530_v11  ;;  %v2005_v17 = vpack.c.bf16 %v504_v9, %v497_v6  ;;  %v396_v26 = vand.u32 4294901760, %v2805_v29 }
  0x76   : > { %2000 = vmatpush3.bf16.msra.mxu1 %v2783_v62  ;;  %2072 = vmatpush3.bf16.msra.mxu0 %v2783_v62  ;;  %v3216_v21 = vand.u32 4294901760, %v2854_v38  ;;  %v2876_v54 = vsub.f32 %v281_v61, %v2845_v30  ;;  %v3256_v59 = vand.u32 4294901760, %v2743_v45  ;;  %v525_v12 = vand.u32 4294901760, %v524_v23 }
  0x77   : > { %2002 = vmatprep.subr.bf16.mxu1 %v2789_v63  ;;  %2074 = vmatprep.subr.bf16.mxu0 %v2789_v63  ;;  %v532_v13 = vand.u32 4294901760, %v531_v49  ;;  %v544_v56 = vand.u32 4294901760, %v2859_v58  ;;  %v406_v8 = vand.u32 4294901760, %v2813_v41  ;;  %v2009_v2 = vpack.c.bf16 %v518_v27, %v511_v10  ;;  %v244_v10 = vld [vmem:[#allocation2 + $0x50] sm:$0xff]  ;;  %v245_v27 = vld [vmem:[#allocation2 + $0x58] sm:$0xff] }
  0x78   : > { %v2081_v43 = vpack.c.bf16 %v516_v60, %v3256_v59  ;;  %v3257_v6 = vand.u32 4294901760, %v2850_v24  ;;  %v284_v29 = vsel %vm258_vm0, %v242_v28, 0  ;;  %v416_v59 = vand.u32 4294901760, %v2866_v16 }
  0x79   : > { %v3258_v49 = vand.u32 4294901760, %v2838_v3  ;;  %v2892_v61 = vpack.c.bf16 %v530_v11, %v523_v4  ;;  %v545_v41 = vsub.f32 %v2859_v58, %v544_v56  ;;  %v435_v28 = vsub.f32 %v2854_v38, %v3216_v21 }
  0x7a   : > { %v538_v9 = vsub.f32 %v2850_v24, %v3257_v6  ;;  %2004 = vmatpush3.bf16.msra.mxu1 %v2789_v63  ;;  %2076 = vmatpush3.bf16.msra.mxu0 %v2789_v63  ;;  %v2900_v16 = vand.u32 4294901760, %v284_v29  ;;  %v287_v6 = vsel %vm258_vm0, %v243_v7, 0  ;;  %v3259_v11 = vand.u32 4294901760, %v2678_v14 }
  0x7b   : > { %v425_v60 = vsub.f32 %v2838_v3, %v3258_v49  ;;  %2006 = vmatprep.subr.bf16.mxu1 %v2005_v17  ;;  %2078 = vmatprep.subr.bf16.mxu0 %v2796_v22  ;;  %v2013_v49 = vpack.c.bf16 %v532_v13, %v525_v12  ;;  %v2903_v4 = vand.u32 4294901760, %v287_v6  ;;  %v3260_v0 = vand.u32 4294901760, %v2685_v18 }
  0x7c   : > { %v2908_v5 = vsub.f32 %v2678_v14, %v3259_v11  ;;  %v3261_v21 = vand.u32 4294901760, %v2772_v57  ;;  %v3262_v23 = vand.u32 4294901760, %v2734_v40  ;;  %v539_v7 = vand.u32 4294901760, %v538_v9 }
  0x7d   : > { %v2913_v1 = vsub.f32 %v2685_v18, %v3260_v0  ;;  %v2920_v12 = vsub.f32 %v284_v29, %v2900_v16  ;;  %v290_v13 = vsel %vm258_vm0, %v244_v10, 0  ;;  %v293_v11 = vsel %vm258_vm0, %v245_v27, 0 }
  0x7e   : > { %1754 = vmatmul.mubr.f32.vlgmr.msra.gmra.mrb[0].mxu1 %v3261_v21  ;;  %1880 = vmatmul.mubr.f32.vlgmr.msra.gmra.mrb[0].mxu0 %v3262_v23  ;;  %v546_v14 = vand.u32 4294901760, %v545_v41  ;;  %v2926_v0 = vsub.f32 %v287_v6, %v2903_v4  ;;  %v551_v21 = vand.u32 4294901760, %v2908_v5  ;;  %v3264_v9 = vand.u32 4294901760, %v2754_v50 }
  0x7f   : > { %2008 = vmatpush3.bf16.msra.mxu1 %v2005_v17  ;;  %2080 = vmatpush3.bf16.msra.mxu0 %v2796_v22  ;;  %v558_v57 = vand.u32 4294901760, %v2913_v1  ;;  %v454_v29 = vand.u32 4294901760, %v2920_v12  ;;  %v2933_v10 = vand.u32 4294901760, %v290_v13  ;;  %v2935_v27 = vand.u32 4294901760, %v293_v11 }
  0x80   : > { %3263 = vst [vmem:[#allocation30_spill] sm:$0xff] %v2926_v0  ;;  %1756 = vmatprep.mubr.f32.mxu1 %v396_v26  ;;  %1882 = vmatprep.mubr.f32.mxu0 %v3264_v9  ;;  %v3266_v22 = vand.u32 4294901760, %v2688_v19  ;;  %v426_v41 = vand.u32 4294901760, %v425_v60  ;;  %v3267_v23 = vand.u32 4294901760, %v2876_v54  ;;  %v552_v6 = vsub.f32 %v2908_v5, %v551_v21 }
  0x81   : > { %3265 = vst [vmem:[#allocation31_spill] sm:$0xff] %v2935_v27  ;;  %2010 = vmatprep.subr.bf16.mxu1 %v2009_v2  ;;  %2082 = vmatprep.subr.bf16.mxu0 %v2081_v43  ;;  %v559_v9 = vsub.f32 %v2913_v1, %v558_v57  ;;  %v3268_v18 = vand.u32 4294901760, %v2765_v53  ;;  %v464_v50 = vand.u32 4294901760, %v2926_v0  ;;  %v2017_v39 = vpack.c.bf16 %v546_v14, %v539_v7 }
  0x82   : > { %v2940_v17 = vsub.f32 %v2688_v19, %v3266_v22  ;;  %v445_v26 = vsub.f32 %v2876_v54, %v3267_v23  ;;  %1757 = vmatmul.mubr.f32.gmra.mrb[2].mxu1 %v406_v8  ;;  %v2951_v22 = vsub.f32 %v290_v13, %v2933_v10  ;;  %v2954_v19 = vsub.f32 %v293_v11, %v2935_v27 }
  0x83   : > { %1883 = vmatmul.mubr.f32.gmra.mrb[2].mxu0 %v3268_v18  ;;  %2012 = vmatpush3.bf16.msra.mxu1 %v2009_v2  ;;  %v3269_v23 = vand.u32 4294901760, %v2850_v24  ;;  %v3270_v8 = vand.u32 4294901760, %v2723_v35  ;;  %v3271_v18 = vand.u32 4294901760, %v2826_v52  ;;  %v436_v13 = vand.u32 4294901760, %v435_v28 }
  0x84   : > { %v565_v60 = vand.u32 4294901760, %v2940_v17  ;;  %2084 = vmatpush3.bf16.msra.mxu0 %v2081_v43  ;;  %1759 = vmatprep.mubr.f32.mxu1 %v416_v59  ;;  %v455_v11 = vsub.f32 %v2920_v12, %v454_v29  ;;  %v474_v27 = vand.u32 4294901760, %v2951_v22  ;;  %v553_v2 = vand.u32 4294901760, %v552_v6 }
  0x85   : > { %v2089_v40 = vpack.c.bf16 %v544_v56, %v3269_v23  ;;  %v2962_v53 = vsub.f32 %v2723_v35, %v3270_v8  ;;  %1885 = vmatprep.mubr.f32.mxu0 %v3271_v18  ;;  %2014 = vmatprep.subr.bf16.mxu1 %v2013_v49  ;;  %v560_v43 = vand.u32 4294901760, %v559_v9  ;;  %v3272_v59 = vand.u32 4294901760, %v2838_v3 }
  0x86   : > { %2086 = vmatprep.subr.bf16.mxu0 %v2892_v61  ;;  %v566_v56 = vsub.f32 %v2940_v17, %v565_v60  ;;  %1760 = vmatmul.mubr.f32.gmra.mrb[4].mxu1 %v426_v41  ;;  %v446_v8 = vand.u32 4294901760, %v445_v26  ;;  %v465_v14 = vsub.f32 %v2926_v0, %v464_v50  ;;  %v484_v28 = vand.u32 4294901760, %v2954_v19 }
  0x87   : > { %v572_v23 = vand.u32 4294901760, %v2962_v53  ;;  %1886 = vmatmul.mubr.f32.gmra.mrb[4].mxu0 %v3272_v59  ;;  %2016 = vmatpush3.bf16.msra.mxu1 %v2013_v49  ;;  %v3273_v6 = vand.u32 4294901760, %v2854_v38  ;;  %v456_v9 = vand.u32 4294901760, %v455_v11  ;;  %v475_v41 = vsub.f32 %v2951_v22, %v474_v27 }
  0x88   : > { %2088 = vmatpush3.bf16.msra.mxu0 %v2892_v61  ;;  %1762 = vmatprep.mubr.f32.mxu1 %v436_v13  ;;  %v2021_v18 = vpack.c.bf16 %v560_v43, %v553_v2  ;;  %v2093_v26 = vpack.c.bf16 %v558_v57, %v551_v21  ;;  %v567_v59 = vand.u32 4294901760, %v566_v56  ;;  %v3274_v49 = vand.u32 4294901760, %v2876_v54  ;;  %v3285_v57 = vld [vmem:[#allocation19_spill] sm:$0xff] }
  0x89   : > { %v573_v7 = vsub.f32 %v2962_v53, %v572_v23  ;;  %1888 = vmatprep.mubr.f32.mxu0 %v3273_v6  ;;  %2018 = vmatprep.subr.bf16.mxu1 %v2017_v39  ;;  %v466_v61 = vand.u32 4294901760, %v465_v14  ;;  %v485_v0 = vsub.f32 %v2954_v19, %v484_v28  ;;  %v476_v13 = vand.u32 4294901760, %v475_v41  ;;  %v3288_v14 = vld [vmem:[#allocation20_spill] sm:$0xff] }
  0x8a   : > { %2090 = vmatprep.subr.bf16.mxu0 %v2089_v40  ;;  %1763 = vmatmul.mubr.f32.gmra.mrb[6].mxu1 %v446_v8  ;;  %v2097_v6 = vpack.c.bf16 %v572_v23, %v565_v60  ;;  %v3287_v23 = vld [vmem:[#allocation21_spill] sm:$0xff] }
  0x8b   : > { %v574_v35 = vand.u32 4294901760, %v573_v7  ;;  %1889 = vmatmul.mubr.f32.gmra.mrb[6].mxu0 %v3274_v49  ;;  %2020 = vmatpush3.bf16.msra.mxu1 %v2017_v39  ;;  %v486_v21 = vand.u32 4294901760, %v485_v0  ;;  %v2029_v39 = vpack.c.bf16 %v2726_v36, %v2712_v33  ;;  %v2037_v33 = vpack.c.bf16 %v2831_v55, %v2821_v51  ;;  %v3278_v36 = vld [vmem:[#allocation28_spill] sm:$0xff]  ;;  %v3283_v51 = vld [vmem:[#allocation17_spill] sm:$0xff]  ;;  %v3289_v49 = vld [vmem:[#allocation23_spill] sm:$0xff] }
  0x8c   : > { %2092 = vmatpush3.bf16.msra.mxu0 %v2089_v40  ;;  %1765 = vmatprep.mubr.f32.mxu1 %v456_v9  ;;  %v3279_v40 = vld [vmem:[#allocation29_spill] sm:$0xff]  ;;  %v3284_v55 = vld [vmem:[#allocation16_spill] sm:$0xff] }
  0x8d   : > { %1891 = vmatprep.mubr.f32.mxu0 %v454_v29  ;;  %2022 = vmatprep.subr.bf16.mxu1 %v2021_v18  ;;  %v2025_v11 = vpack.c.bf16 %v574_v35, %v567_v59  ;;  %v2033_v35 = vpack.c.bf16 %v2746_v46, %v2743_v45 }
  0x8e   : > { %2094 = vmatprep.subr.bf16.mxu0 %v2093_v26  ;;  %1766 = vmatmul.mubr.f32.gmra.mrb[8].mxu1 %v466_v61 }
  0x8f   : > { %1892 = vmatmul.mubr.f32.gmra.mrb[8].mxu0 %v464_v50  ;;  %2024 = vmatpush3.bf16.msra.mxu1 %v2021_v18 }
  0x90   : > { %2096 = vmatpush3.bf16.msra.mxu0 %v2093_v26  ;;  %1768 = vmatprep.mubr.f32.mxu1 %v476_v13  ;;  %v3290_v13 = vld [vmem:[#allocation22_spill] sm:$0xff] }
  0x91   : > { %1894 = vmatprep.mubr.f32.mxu0 %v474_v27  ;;  %2026 = vmatprep.subr.bf16.mxu1 %v2025_v11 }
  0x92   : > { %2098 = vmatprep.subr.bf16.mxu0 %v2097_v6  ;;  %1769 = vmatmul.mubr.f32.gmra.mrb[10].mxu1 %v486_v21 }
  0x93   : > { %1895 = vmatmul.mubr.f32.gmra.mrb[10].mxu0 %v484_v28  ;;  %2028 = vmatpush3.bf16.msra.mxu1 %v2025_v11 }
  0x94   : > { %2100 = vmatpush3.bf16.msra.mxu0 %v2097_v6  ;;  %1795 = vmatprep.mubr.f32.mxu1 %v2707_v31 }
  0x95   : > { %1921 = vmatprep.mubr.f32.mxu0 %v2707_v31  ;;  %2030 = vmatprep.subr.bf16.mxu1 %v2029_v39 }
  0x96   : > { %2102 = vmatprep.subr.bf16.mxu0 %v2680_v15  ;;  %1796 = vmatmul.mubr.f32.vlgmr.msra.gmra.mrb[0].mxu1 %v2709_v32 }
  0x97   : > { %1922 = vmatmul.mubr.f32.vlgmr.msra.gmra.mrb[0].mxu0 %v2709_v32  ;;  %2032 = vmatpush3.bf16.msra.mxu1 %v2029_v39 }
  0x98   : > { %2104 = vmatpush3.bf16.msra.mxu0 %v2680_v15  ;;  %1798 = vmatprep.mubr.f32.mxu1 %v2737_v42  ;;  %v2041_v15 = vpack.c.bf16 %v2859_v58, %v2850_v24 }
  0x99   : > { %1924 = vmatprep.mubr.f32.mxu0 %v2737_v42  ;;  %2034 = vmatprep.subr.bf16.mxu1 %v2033_v35 }
  0x9a   : > { %2106 = vmatprep.subr.bf16.mxu0 %v2690_v20  ;;  %1799 = vmatmul.mubr.f32.gmra.mrb[2].mxu1 %v2740_v44 }
  0x9b   : > { %1925 = vmatmul.mubr.f32.gmra.mrb[2].mxu0 %v2740_v44  ;;  %2036 = vmatpush3.bf16.msra.mxu1 %v2033_v35 }
  0x9c   : > { %2108 = vmatpush3.bf16.msra.mxu0 %v2690_v20  ;;  %1801 = vmatprep.mubr.f32.mxu1 %v2807_v37  ;;  %v2045_v20 = vpack.c.bf16 %v2913_v1, %v2908_v5  ;;  %v3275_v1 = vld [vmem:[#allocation31_spill] sm:$0xff]  ;;  %v3276_v5 = vld [vmem:[#allocation26_spill] sm:$0xff] }
  0x9d   : > { %1927 = vmatprep.mubr.f32.mxu0 %v2807_v37  ;;  %2038 = vmatprep.subr.bf16.mxu1 %v2037_v33 }
  0x9e   : > { %2110 = vmatprep.subr.bf16.mxu0 %v2699_v25  ;;  %1802 = vmatmul.mubr.f32.gmra.mrb[4].mxu1 %v2816_v48 }
  0x9f   : > { %1928 = vmatmul.mubr.f32.gmra.mrb[4].mxu0 %v2816_v48  ;;  %2040 = vmatpush3.bf16.msra.mxu1 %v2037_v33 }
  0xa0   : > { %2112 = vmatpush3.bf16.msra.mxu0 %v2699_v25  ;;  %1804 = vmatprep.mubr.f32.mxu1 %v2841_v47  ;;  %v2049_v25 = vpack.c.bf16 %v2962_v53, %v2940_v17  ;;  %v3282_v53 = vld [vmem:[#allocation14_spill] sm:$0xff] }
  0xa1   : > { %1930 = vmatprep.mubr.f32.mxu0 %v2841_v47  ;;  %2042 = vmatprep.subr.bf16.mxu1 %v2041_v15 }
  0xa2   : > { %2114 = vmatprep.subr.bf16.mxu0 %v2720_v34  ;;  %1805 = vmatmul.mubr.f32.gmra.mrb[6].mxu1 %v2845_v30 }
  0xa3   : > { %1931 = vmatmul.mubr.f32.gmra.mrb[6].mxu0 %v2845_v30  ;;  %2044 = vmatpush3.bf16.msra.mxu1 %v2041_v15 }
  0xa4   : > { %2116 = vmatpush3.bf16.msra.mxu0 %v2720_v34  ;;  %1807 = vmatprep.mubr.f32.mxu1 %v2900_v16  ;;  %v3277_v34 = vld [vmem:[#allocation27_spill] sm:$0xff] }
  0xa5   : > { %1933 = vmatprep.mubr.f32.mxu0 %v2900_v16  ;;  %2046 = vmatprep.subr.bf16.mxu1 %v2045_v20 }
  0xa6   : > { %2118 = vmatprep.subr.bf16.mxu0 %v2783_v62  ;;  %1808 = vmatmul.mubr.f32.gmra.mrb[8].mxu1 %v2903_v4 }
  0xa7   : > { %1934 = vmatmul.mubr.f32.gmra.mrb[8].mxu0 %v2903_v4  ;;  %2048 = vmatpush3.bf16.msra.mxu1 %v2045_v20  ;;  %v3291_v20 = vld [vmem:[#allocation25_spill] sm:$0xff] }
  0xa8   : > { %2120 = vmatpush3.bf16.msra.mxu0 %v2783_v62  ;;  %1810 = vmatprep.mubr.f32.mxu1 %v2933_v10 }
  0xa9   : > { %1936 = vmatprep.mubr.f32.mxu0 %v2933_v10  ;;  %2050 = vmatprep.subr.bf16.mxu1 %v2049_v25 }
  0xaa   : > { %2122 = vmatprep.subr.bf16.mxu0 %v2789_v63  ;;  %1811 = vmatmul.mubr.f32.gmra.mrb[10].mxu1 %v3275_v1 }
  0xab   : > { %1937 = vmatmul.mubr.f32.gmra.mrb[10].mxu0 %v3275_v1  ;;  %2052 = vmatpush3.bf16.msra.mxu1 %v2049_v25 }
  0xac   : > { %2124 = vmatpush3.bf16.msra.mxu0 %v2789_v63  ;;  %1837 = vmatprep.mubr.f32.mxu1 %v3276_v5 }
  0xad   : > { %1963 = vmatprep.mubr.f32.mxu0 %v2707_v31  ;;  %v3280_v31 = vld [vmem:[#allocation30_spill] sm:$0xff] }
  0xae   : > { %1838 = vmatmul.mubr.f32.vlgmr.msra.gmra.mrb[0].mxu1 %v3277_v34 }
  0xaf   : > { %1964 = vmatmul.mubr.f32.vlgmr.msra.gmra.mrb[0].mxu0 %v2709_v32  ;;  %1840 = vmatprep.mubr.f32.mxu1 %v3278_v36 }
  0xb0   : > { %1966 = vmatprep.mubr.f32.mxu0 %v2737_v42 }
  0xb2   : > { %1841 = vmatmul.mubr.f32.gmra.mrb[2].mxu1 %v3279_v40 }
  0xb3   : > { %1967 = vmatmul.mubr.f32.gmra.mrb[2].mxu0 %v2740_v44  ;;  %1843 = vmatprep.mubr.f32.mxu1 %v2826_v52 }
  0xb4   : > { %1969 = vmatprep.mubr.f32.mxu0 %v2807_v37 }
  0xb6   : > { %1844 = vmatmul.mubr.f32.gmra.mrb[4].mxu1 %v2838_v3 }
  0xb7   : > { %1970 = vmatmul.mubr.f32.gmra.mrb[4].mxu0 %v2816_v48  ;;  %1846 = vmatprep.mubr.f32.mxu1 %v2854_v38 }
  0xb8   : > { %1972 = vmatprep.mubr.f32.mxu0 %v2841_v47  ;;  %v3281_v47 = vld [vmem:[#allocation15_spill] sm:$0xff] }
  0xba   : > { %1847 = vmatmul.mubr.f32.gmra.mrb[6].mxu1 %v2876_v54 }
  0xbb   : > { %1973 = vmatmul.mubr.f32.gmra.mrb[6].mxu0 %v2845_v30  ;;  %1849 = vmatprep.mubr.f32.mxu1 %v2920_v12 }
  0xbc   : > { %1975 = vmatprep.mubr.f32.mxu0 %v2900_v16 }
  0xbe   : > { %1850 = vmatmul.mubr.f32.gmra.mrb[8].mxu1 %v3280_v31 }
  0xbf   : > { %1976 = vmatmul.mubr.f32.gmra.mrb[8].mxu0 %v2903_v4  ;;  %1852 = vmatprep.mubr.f32.mxu1 %v2951_v22 }
  0xc0   : > { %1978 = vmatprep.mubr.f32.mxu0 %v2933_v10  ;;  %v3286_v10 = vld [vmem:[#allocation18_spill] sm:$0xff] }
  0xc2   : > { %1853 = vmatmul.mubr.f32.gmra.mrb[10].mxu1 %v2954_v19 }
  0xc3   : > { %1979 = vmatmul.mubr.f32.gmra.mrb[10].mxu0 %v3275_v1  ;;  %v3292_v1 = vld [vmem:[#allocation24_spill] sm:$0xff] }
 0x181   : > { %v1839_v32 = vpop.f32.mrb[0].mxu1 }
 0x182   : > { %v1965_v42 = vpop.f32.mrb[0].mxu0  ;;  %v781_v44 = vpop.f32.mrb[1].mxu1 }
 0x183   : > { %v2125_v30 = vadd.f32 %v1965_v42, %v1839_v32  ;;  %v1287_v45 = vpop.f32.mrb[1].mxu0 }
 0x184   : > { %v2126_v46 = vadd.f32 %v1287_v45, %v781_v44 }
 0x185   : > { %1358 = vst [vmem:[%s3056_s20 + $0x8] sm:$0xff] %v2125_v30  ;;  %v1382_v50 = vsub.f32 %v3281_v47, %v2125_v30  ;;  %v1842_v54 = vpop.f32.mrb[2].mxu1 }
 0x186   : > { %1357 = vst [vmem:[%s3056_s20] sm:$0xff] %v2126_v46  ;;  %v1381_v19 = vsub.f32 %v3282_v53, %v2126_v46  ;;  %v1968_v58 = vpop.f32.mrb[2].mxu0  ;;  %v795_v63 = vpop.f32.mrb[3].mxu1 }
 0x187   : > { %1394 = vst [vmem:[%s3063_s22 + $0x8] sm:$0xff] %v1382_v50  ;;  %v2127_v62 = vadd.f32 %v1968_v58, %v1842_v54  ;;  %v1299_v37 = vpop.f32.mrb[3].mxu0 }
 0x188   : > { %1393 = vst [vmem:[%s3063_s22] sm:$0xff] %v1381_v19  ;;  %v2128_v48 = vadd.f32 %v1299_v37, %v795_v63 }
 0x189   : > { %1360 = vst [vmem:[%s3056_s20 + $0x18] sm:$0xff] %v2127_v62  ;;  %v1384_v52 = vsub.f32 %v3283_v51, %v2127_v62  ;;  %v1845_v24 = vpop.f32.mrb[4].mxu1 }
 0x18a   : > { %1359 = vst [vmem:[%s3056_s20 + $0x10] sm:$0xff] %v2128_v48  ;;  %v1383_v3 = vsub.f32 %v3284_v55, %v2128_v48  ;;  %v1971_v38 = vpop.f32.mrb[4].mxu0  ;;  %v809_v4 = vpop.f32.mrb[5].mxu1 }
 0x18b   : > { %1396 = vst [vmem:[%s3063_s22 + $0x18] sm:$0xff] %v1384_v52  ;;  %v2129_v16 = vadd.f32 %v1971_v38, %v1845_v24  ;;  %v1311_v12 = vpop.f32.mrb[5].mxu0 }
 0x18c   : > { %1395 = vst [vmem:[%s3063_s22 + $0x10] sm:$0xff] %v1383_v3  ;;  %v2130_v0 = vadd.f32 %v1311_v12, %v809_v4 }
 0x18d   : > { %1362 = vst [vmem:[%s3056_s20 + $0x28] sm:$0xff] %v2129_v16  ;;  %v1386_v29 = vsub.f32 %v3285_v57, %v2129_v16  ;;  %v1848_v17 = vpop.f32.mrb[6].mxu1 }
 0x18e   : > { %1361 = vst [vmem:[%s3056_s20 + $0x20] sm:$0xff] %v2130_v0  ;;  %v1385_v27 = vsub.f32 %v3286_v10, %v2130_v0  ;;  %v1974_v22 = vpop.f32.mrb[6].mxu0  ;;  %v823_v2 = vpop.f32.mrb[7].mxu1 }
 0x18f   : > { %1398 = vst [vmem:[%s3063_s22 + $0x28] sm:$0xff] %v1386_v29  ;;  %v2131_v60 = vadd.f32 %v1974_v22, %v1848_v17  ;;  %v1323_v43 = vpop.f32.mrb[7].mxu0 }
 0x190   : > { %1397 = vst [vmem:[%s3063_s22 + $0x20] sm:$0xff] %v1385_v27  ;;  %v2132_v56 = vadd.f32 %v1323_v43, %v823_v2 }
 0x191   : > { %1364 = vst [vmem:[%s3056_s20 + $0x38] sm:$0xff] %v2131_v60  ;;  %v1388_v8 = vsub.f32 %v3287_v23, %v2131_v60  ;;  %v1851_v7 = vpop.f32.mrb[8].mxu1 }
 0x192   : > { %1363 = vst [vmem:[%s3056_s20 + $0x30] sm:$0xff] %v2132_v56  ;;  %v1387_v28 = vsub.f32 %v3288_v14, %v2132_v56  ;;  %v1977_v9 = vpop.f32.mrb[8].mxu0  ;;  %v837_v18 = vpop.f32.mrb[9].mxu1 }
 0x193   : > { %1400 = vst [vmem:[%s3063_s22 + $0x38] sm:$0xff] %v1388_v8  ;;  %v2133_v41 = vadd.f32 %v1977_v9, %v1851_v7  ;;  %v1335_v26 = vpop.f32.mrb[9].mxu0 }
 0x194   : > { %1399 = vst [vmem:[%s3063_s22 + $0x30] sm:$0xff] %v1387_v28  ;;  %v2134_v59 = vadd.f32 %v1335_v26, %v837_v18 }
 0x195   : > { %1366 = vst [vmem:[%s3056_s20 + $0x48] sm:$0xff] %v2133_v41  ;;  %v1390_v61 = vsub.f32 %v3289_v49, %v2133_v41  ;;  %v1854_v6 = vpop.f32.mrb[10].mxu1 }
 0x196   : > { %1365 = vst [vmem:[%s3056_s20 + $0x40] sm:$0xff] %v2134_v59  ;;  %v1389_v11 = vsub.f32 %v3290_v13, %v2134_v59  ;;  %v1980_v21 = vpop.f32.mrb[10].mxu0  ;;  %v851_v35 = vpop.f32.mrb[11].mxu1 }
 0x197   : > { %1402 = vst [vmem:[%s3063_s22 + $0x48] sm:$0xff] %v1390_v61  ;;  %v2135_v39 = vadd.f32 %v1980_v21, %v1854_v6  ;;  %v1347_v33 = vpop.f32.mrb[11].mxu0 }
 0x198   : > { %1401 = vst [vmem:[%s3063_s22 + $0x40] sm:$0xff] %v1389_v11  ;;  %v2136_v15 = vadd.f32 %v1347_v33, %v851_v35 }
 0x199   : > { %1368 = vst [vmem:[%s3056_s20 + $0x58] sm:$0xff] %v2135_v39  ;;  %v1392_v25 = vsub.f32 %v3291_v20, %v2135_v39 }
 0x19a   : > { %1367 = vst [vmem:[%s3056_s20 + $0x50] sm:$0xff] %v2136_v15  ;;  %v1391_v5 = vsub.f32 %v3292_v1, %v2136_v15 }
 0x19b   : > { %1404 = vst [vmem:[%s3063_s22 + $0x58] sm:$0xff] %v1392_v25 }
 0x19c   : > { %2343 = shalt.err (!%p2340_p5)
}
 0x19d   : > { %s2344_s10 = scalar_lea.hbm %s3097_s19, 1536  ;;  %s2348_s15 = scalar_lea.hbm %s3194_s3, 3072 }
 0x19e   : > { %p2345_p9 = scmp.ne.s32.totalorder %s3097_s19, %s2344_s10  ;;  %p2349_p3 = scmp.lt.u32.totalorder %s3097_s19, %s3194_s3 }
 0x19f   : > { %p2350_p7 = scmp.lt.u32.totalorder %s2348_s15, %s2344_s10  ;;  %p2352_p4 = scmp.lt.u32.totalorder %s2344_s10, %s3097_s19 }
 0x1a0   : > { %p2346_p1 = pnand %p2345_p9, %p2573_p10 }
 0x1a1   : > { %p2351_p11 = por %p2350_p7, %p2349_p3 }
 0x1a2   : > { %p2347_p2 = pneg %p2346_p1 }
 0x1a3   : > { %p2353_p6 = por %p2352_p4, %p2351_p11 }
 0x1a5   : > { %p2354_p8 = pnand %p2353_p6, %p2347_p2 }
 0x1a7   : > { %2357 = shalt.err (!%p2354_p8)
}
 0x1a8   : > { %s2455_s9 = smov 128   ;;  %s2456_s27 = smov 8   ;;  %1403 = vst [vmem:[%s3063_s22 + $0x50] sm:$0xff] %v1391_v5 }
 0x1a9   : > { %2197 = dma.vmem_to_hbm [thread:$0]  (%p2573_p10), %s3099_s11, 1536, %s3097_s19, %s1411_s21, %s2455_s9, %s2455_s9, %s2456_s27  }
 0x1aa   : > { %s1406_s4 = scalar_lea.sflag [#allocation4], %s2634_s25  ;;  %s2358_s8 = scalar_lea.vmem %s3110_s7, 1536 }
 0x1ab   : > { %p2359_p12 = scmp.ne.s32.totalorder %s3110_s7, %s2358_s8  ;;  %s2457_s26 = smov [#allocation7]  }
 0x1ac   : > { %s2362_s10 = sshll.u32 %s2457_s26, 4  ;;  %s2363_s10 = int_to_ptr.vmem [resolvable:$false] %s2362_s10 }
 0x1ad   : > { %p2360_p13 = pnand %p2359_p12, %p2573_p10  ;;  %s2364_s20 = scalar_lea.vmem %s2363_s10, 3072 }
 0x1ae   : > { %p2365_p5 = scmp.lt.s32.totalorder %s3110_s7, %s2363_s10  ;;  %p2366_p9 = scmp.lt.s32.totalorder %s2364_s20, %s2358_s8 }
 0x1af   : > { %p2361_p0 = pneg %p2360_p13 }
 0x1b0   : > { %p2367_p1 = por %p2366_p9, %p2365_p5 }
 0x1b2   : > { %p2368_p2 = pnand %p2367_p1, %p2361_p0 }
 0x1b4   : > { %2371 = shalt.err (!%p2368_p2)
}
 0x1b5   : > { %s2372_s22 = scalar_lea.hbm %s3108_s30, 1536  ;;  %s2376_s21 = scalar_lea.hbm %s3193_s2, 3072 }
 0x1b6   : > { %p2373_p3 = scmp.ne.s32.totalorder %s3108_s30, %s2372_s22  ;;  %p2377_p4 = scmp.lt.u32.totalorder %s3108_s30, %s3193_s2 }
 0x1b7   : > { %p2378_p6 = scmp.lt.u32.totalorder %s2376_s21, %s2372_s22  ;;  %p2380_p12 = scmp.lt.u32.totalorder %s2372_s22, %s3108_s30 }
 0x1b8   : > { %p2374_p7 = pnand %p2373_p3, %p2573_p10 }
 0x1b9   : > { %p2379_p8 = por %p2378_p6, %p2377_p4 }
 0x1ba   : > { %p2375_p11 = pneg %p2374_p7 }
 0x1bb   : > { %p2381_p13 = por %p2380_p12, %p2379_p8 }
 0x1bd   : > { %p2382_p0 = pnand %p2381_p13, %p2375_p11 }
 0x1bf   : > { %2385 = shalt.err (!%p2382_p0)
}
 0x1c0   : > { %2196 = dma.vmem_to_hbm [thread:$0]  (%p2573_p10), %s3110_s7, 1536, %s3108_s30, %s1406_s4, %s2455_s9, %s2455_s9, %s2456_s27  }
 0x1c1 PF: > { %s1457_s18 = sand.u32 1, %s2428_s12   ;;  %p3293_p5 = scmp.ne.s32.totalorder %s3231_s23, 0 }
 0x1c2   : > { %p3294_p9 = scmp.ge.s32.totalorder %s2448_s17, 2  ;;  %s1458_s6 = scalar_lea.sflag [#allocation4], %s1457_s18 }
 0x1c4   : > { %p2209_p1 = pnand %p3294_p9, %p3293_p5 }
 0x1c6   : > { %2419 = dma.done.wait (!%p2209_p1), %s1458_s6, 1536  }
 0x1c7   : > { %2421 = vsyncadd (!%p2209_p1), %s1458_s6, 4294965760  ;;  %s1467_s29 = scalar_lea.sflag [#allocation9], %s1457_s18 }
 0x1c8   : > { %2423 = dma.done.wait (!%p2209_p1), %s1467_s29, 1536  }
 0x1c9   : > { %2425 = vsyncadd (!%p2209_p1), %s1467_s29, 4294965760  ;;  %s24_s17 = sadd.s32 1, %s2448_s17   ;;  %s3295_s12 = smov %s2432_s13 }
 0x1ca   : > { %p21_p2 = scmp.ge.s32.totalorder %s24_s17, 4   ;;  %s3296_s13 = smov %s2436_s14 }
 0x1cb   : > { %s3297_s14 = smov %s2582_s5  ;;  %s3298_s15 = smov %s2444_s16 }
 0x1cc   : > { %s3299_s16 = smov %s3301_s28  ;;  %23 = sbr.rel (!%p21_p2) target bundleno = 9 (0x9), region = 95 }
 0x1d3   :  { %1472 = vsyncpa [#allocation3], 1 }
 0x1d4   :  { %1474 = vsyncpa [#allocation3 + $0x1], 1 }
 0x1d5   :  { %1475 = vsyncpa [#allocation6], 1 }
 0x1d6   :  { %1477 = vsyncpa [#allocation6 + $0x1], 1 }
 0x1d7   :  { %1478 = vsyncpa [#allocation4], 1 }
 0x1d8   :  { %1480 = vsyncpa [#allocation4 + $0x1], 1 }
 0x1d9   :  { %1481 = vsyncpa [#allocation9], 1 }
 0x1da   :  { %1483 = vsyncpa [#allocation9 + $0x1], 1 }

</bundles_post_ra>
